<compile_context>
chip_gen: v5e
topology: v5e:2x2
jax: 0.10.0
libtpu: 0.0.40
codegen_flags: <defaults>
</compile_context>

<pallas_src>
import jax
import jax.numpy as jnp
from jax.experimental import pallas as pl
from jax.experimental.pallas import tpu as pltpu

K = 8          # conv kernel size (both convs)
PAD = 4        # conv padding (both convs)
C_IN = 9       # input channels
C_PAD = 16     # input channels padded to 16 lanes per time step (alignment)
C1 = 32        # conv1 out channels
C2 = 64        # conv2 out channels
OUT_DIM = 64   # projection output dim

POS1 = 8       # conv1 output positions per block-Toeplitz matmul (-> 4 pooled)
SLAB1 = 16     # input time steps read per conv1 group (POS1 + K = 16 -> 256 lanes)
POS2 = 4       # conv2 output positions per matmul (-> 2 pooled)
SLAB2 = 12     # p1 positions read per conv2 group (POS2 + K = 12 -> 384 lanes)


def _make_kernel(P1, P2, n_g1, n_g2, p1_lanes):
    def kernel(x_ref, w1_ref, w2_ref, wp1_ref, wp2_ref, bias_ref,
               out_ref, p1_ref):
        # x_ref : (Bb, t_in * C_PAD)    zero-padded, channel-padded, time-major
        # p1_ref: (Bb, p1_lanes)        scratch: padded, flattened conv2 input
        # out_ref: (Bb, C2 + OUT_DIM)   packed [h | z]
        Bb = x_ref.shape[0]
        w1 = w1_ref[...]                     # (256, 256) block-Toeplitz conv1 weight
        w2 = w2_ref[...]                     # (384, 256) block-Toeplitz conv2 weight
        b1t = jnp.broadcast_to(bias_ref[:, 0:128], (Bb, 128))    # conv1 bias x4
        b2t = jnp.broadcast_to(bias_ref[:, 128:256], (Bb, 128))  # conv2 bias x2
        bp1 = bias_ref[:, 256:320]           # (1, 64)
        bp2 = bias_ref[:, 320:384]           # (1, 64)

        # Zero the padding regions of the conv2-input scratch.
        p1_ref[:, 0:PAD * C1] = jnp.zeros((Bb, PAD * C1), jnp.float32)
        tail = (PAD + P1) * C1
        if tail < p1_lanes:
            p1_ref[:, tail:p1_lanes] = jnp.zeros((Bb, p1_lanes - tail), jnp.float32)

        # TODO(synk): for very long sequences, switch these static per-group
        # Python loops to lax.fori_loop(..., unroll=4) with pl.ds/pl.multiple_of
        # indexing, and optionally cast matmul operands to bfloat16.

        # ---- Conv1d(9->32, k=8, pad=4) + ReLU + MaxPool1d(2) -----------------
        for g in range(n_g1):
            slab = x_ref[:, g * 128:g * 128 + SLAB1 * C_PAD]          # aligned
            y = jnp.dot(slab, w1, preferred_element_type=jnp.float32)  # (Bb, 256)
            pooled = jnp.maximum(jnp.maximum(y[:, :128], y[:, 128:]) + b1t, 0.0)
            nv = min(4, P1 - 4 * g)                   # valid pooled positions
            dst = (PAD + 4 * g) * C1                  # 128-lane aligned
            p1_ref[:, dst:dst + nv * C1] = pooled[:, :nv * C1]

        # ---- Conv1d(32->64, k=8, pad=4) + ReLU + MaxPool1d(2) + AvgPool(1) ---
        acc = jnp.zeros((Bb, 2 * C2), jnp.float32)
        acc_tail = None
        for g in range(n_g2):
            slab = p1_ref[:, g * 128:g * 128 + SLAB2 * C1]            # aligned
            y = jnp.dot(slab, w2, preferred_element_type=jnp.float32)  # (Bb, 256)
            pooled = jnp.maximum(jnp.maximum(y[:, :128], y[:, 128:]) + b2t, 0.0)
            if min(2, P2 - 2 * g) == 2:
                acc = acc + pooled
            else:                                     # partial last group
                acc_tail = pooled[:, :C2]
        h = acc[:, :C2] + acc[:, C2:]
        if acc_tail is not None:
            h = h + acc_tail
        h = h * (1.0 / P2)                            # adaptive average pool

        # ---- projection MLP: Linear -> ReLU -> Linear -------------------------
        zh = jnp.maximum(
            jnp.dot(h, wp1_ref[...], preferred_element_type=jnp.float32) + bp1, 0.0)
        z = jnp.dot(zh, wp2_ref[...], preferred_element_type=jnp.float32) + bp2

        # Lane-dense packed output: [h | z] -> (Bb, 128), one unmasked store.
        out_ref[...] = jnp.concatenate([h, z], axis=1)

    return kernel


def simclr_forward(x, params, block_b=None):
    """x: (B, T, C_IN) float32.  Returns (h, z) with shapes (B, 64), (B, 64)."""
    B, T, C = x.shape
    assert C == C_IN
    w1, b1, w2, b2, wp1, bp1, wp2, bp2 = params

    L1 = T + 2 * PAD - K + 1
    P1 = L1 // 2
    L2 = P1 + 2 * PAD - K + 1
    P2 = L2 // 2
    assert P1 >= 1 and P2 >= 1, "sequence too short for this encoder"

    n_g1 = -(-2 * P1 // POS1)        # conv1 block-Toeplitz groups
    n_g2 = -(-2 * P2 // POS2)        # conv2 block-Toeplitz groups

    # Padded input time length: enough for every 16-step slab; multiple of 8
    # so the flattened lane count is a multiple of 128.
    t_in = max(T + 2 * PAD, (n_g1 - 1) * POS1 + SLAB1)
    t_in = ((t_in + 7) // 8) * 8
    x_lanes = t_in * C_PAD

    # Conv2-input scratch length (pooled positions); multiple of 4 -> lanes % 128 == 0.
    p1_pos = max(P1 + 2 * PAD, (n_g2 - 1) * POS2 + SLAB2)
    p1_pos = ((p1_pos + 3) // 4) * 4
    p1_lanes = p1_pos * C1

    # Batch tile: 128 by default, 256 for big batches (fills a 256-row MXU);
    # shrink until the double-buffered working set fits VMEM comfortably
    # (v7x has only 64 MiB physical VMEM).
    if block_b is None:
        block_b = 256 if B >= 512 else 128
    B_BLK = min(block_b, ((B + 7) // 8) * 8)

    w_bytes = 4 * (SLAB1 * C_PAD * 2 * 4 * C1 + SLAB2 * C1 * 4 * C2
                   + 2 * C2 * OUT_DIM + 384)

    def vmem_bytes(bb):
        return 4 * bb * (2 * x_lanes + p1_lanes + 2 * (C2 + OUT_DIM)) + 2 * w_bytes

    while B_BLK > 8 and vmem_bytes(B_BLK) > (40 << 20):
        B_BLK = max(8, ((B_BLK // 2 + 7) // 8) * 8)
    Bp = ((B + B_BLK - 1) // B_BLK) * B_BLK

    # ---- wrapper-side layout plumbing (no compute) ---------------------------
    # Zero-pad time by PAD, pad channels 9 -> 16, flatten each sample to one
    # lane-dense row so every conv window starts at a 128-lane multiple.
    xp = jnp.zeros((Bp, t_in, C_PAD), jnp.float32)
    xp = xp.at[:B, PAD:PAD + T, :C_IN].set(x.astype(jnp.float32))
    xflat = xp.reshape(Bp, x_lanes)

    # Block-Toeplitz conv1 weight: (SLAB1*C_PAD, 2*4*C1) = (256, 256);
    # column layout = parity*128 + pooled_pos*32 + out_channel.
    w1_tap = jnp.zeros((K, C_PAD, C1), jnp.float32)
    w1_tap = w1_tap.at[:, :C_IN, :].set(
        jnp.transpose(w1.astype(jnp.float32), (2, 1, 0)))
    w1_big = jnp.zeros((SLAB1, C_PAD, 2, 4, C1), jnp.float32)
    for q in range(4):
        for par in range(2):
            p = 2 * q + par
            w1_big = w1_big.at[p:p + K, :, par, q, :].set(w1_tap)
    w1_big = w1_big.reshape(SLAB1 * C_PAD, 2 * 4 * C1)

    # Block-Toeplitz conv2 weight: (SLAB2*C1, 2*2*C2) = (384, 256);
    # column layout = parity*128 + pooled_pos*64 + out_channel.
    w2_tap = jnp.transpose(w2.astype(jnp.float32), (2, 1, 0))   # (K, C1, C2)
    w2_big = jnp.zeros((SLAB2, C1, 2, 2, C2), jnp.float32)
    for q in range(2):
        for par in range(2):
            p = 2 * q + par
            w2_big = w2_big.at[p:p + K, :, par, q, :].set(w2_tap)
    w2_big = w2_big.reshape(SLAB2 * C1, 2 * 2 * C2)

    wp1_t = wp1.T.astype(jnp.float32)                 # (C2, OUT_DIM)
    wp2_t = wp2.T.astype(jnp.float32)                 # (OUT_DIM, OUT_DIM)

    # All four biases fused into a single lane-dense operand.
    bias_pack = jnp.concatenate([
        jnp.tile(b1.astype(jnp.float32), 4),          # 128 lanes, conv1 bias x4
        jnp.tile(b2.astype(jnp.float32), 2),          # 128 lanes, conv2 bias x2
        bp1.astype(jnp.float32),                      # 64 lanes
        bp2.astype(jnp.float32),                      # 64 lanes
    ]).reshape(1, 2 * 128 + 2 * OUT_DIM)

    kernel = _make_kernel(P1, P2, n_g1, n_g2, p1_lanes)

    grid_spec = pltpu.PrefetchScalarGridSpec(
        num_scalar_prefetch=0,
        grid=(Bp // B_BLK,),
        in_specs=[
            pl.BlockSpec((B_BLK, x_lanes), lambda i: (i, 0)),
            pl.BlockSpec(w1_big.shape, lambda i: (0, 0)),
            pl.BlockSpec(w2_big.shape, lambda i: (0, 0)),
            pl.BlockSpec(wp1_t.shape, lambda i: (0, 0)),
            pl.BlockSpec(wp2_t.shape, lambda i: (0, 0)),
            pl.BlockSpec(bias_pack.shape, lambda i: (0, 0)),
        ],
        out_specs=pl.BlockSpec((B_BLK, C2 + OUT_DIM), lambda i: (i, 0)),
        scratch_shapes=[pltpu.VMEM((B_BLK, p1_lanes), jnp.float32)],
    )

    packed = pl.pallas_call(
        kernel,
        out_shape=jax.ShapeDtypeStruct((Bp, C2 + OUT_DIM), jnp.float32),
        grid_spec=grid_spec,
        compiler_params=pltpu.CompilerParams(
            dimension_semantics=("parallel",),
            vmem_limit_bytes=int(min(max(2 * vmem_bytes(B_BLK), 32 << 20), 64 << 20)),
        ),
    )(xflat, w1_big, w2_big, wp1_t, wp2_t, bias_pack)

    h = packed[:B, :C2]
    z = packed[:B, C2:C2 + OUT_DIM]
    return h, z


def reference_forward(x, params):
    """Plain-JAX reference mirroring the PyTorch forward (for correctness check)."""
    w1, b1, w2, b2, wp1, bp1, wp2, bp2 = params
    xc = jnp.transpose(x, (0, 2, 1))  # (B, C, T), like x.permute(0, 2, 1)

    def conv1d(inp, w, b):
        y = jax.lax.conv_general_dilated(
            inp, w, window_strides=(1,), padding=[(PAD, PAD)],
            dimension_numbers=("NCH", "OIH", "NCH"))
        return y + b[None, :, None]

    def maxpool(y):
        P = y.shape[-1] // 2
        return jnp.maximum(y[..., 0:2 * P:2], y[..., 1:2 * P:2])

    y = maxpool(jnp.maximum(conv1d(xc, w1, b1), 0.0))
    y = maxpool(jnp.maximum(conv1d(y, w2, b2), 0.0))
    h = jnp.mean(y, axis=-1)
    z = jnp.maximum(h @ wp1.T + bp1, 0.0) @ wp2.T + bp2
    return h, z


if __name__ == "__main__":
    key = jax.random.PRNGKey(0)
    ks = jax.random.split(key, 9)
    B, T = 2, 16
    x = jax.random.normal(ks[0], (B, T, C_IN), jnp.float32)

    # Deterministic synthetic parameters (PyTorch layout: Conv1d weight (Cout, Cin, K),
    # Linear weight (out, in)).
    params = (
        0.1 * jax.random.normal(ks[1], (C1, C_IN, K), jnp.float32),
        0.1 * jax.random.normal(ks[2], (C1,), jnp.float32),
        0.1 * jax.random.normal(ks[3], (C2, C1, K), jnp.float32),
        0.1 * jax.random.normal(ks[4], (C2,), jnp.float32),
        0.1 * jax.random.normal(ks[5], (OUT_DIM, C2), jnp.float32),
        0.1 * jax.random.normal(ks[6], (OUT_DIM,), jnp.float32),
        0.1 * jax.random.normal(ks[7], (OUT_DIM, OUT_DIM), jnp.float32),
        0.1 * jax.random.normal(ks[8], (OUT_DIM,), jnp.float32),
    )

    h, z = simclr_forward(x, params)
    jax.block_until_ready((h, z))

    h_exp, z_exp = reference_forward(x, params)
    assert h.shape == (B, C2) and z.shape == (B, OUT_DIM)
    assert jnp.allclose(h, h_exp, atol=1e-4, rtol=1e-4), "h mismatch vs reference"
    assert jnp.allclose(z, z_exp, atol=1e-4, rtol=1e-4), "z mismatch vs reference"

    print("KERNEL_OK")
</pallas_src>

<mosaic_0001>
module attributes {stable_mosaic.version = 11 : i64} {
  func.func @kernel(%arg0: i32, %arg1: memref<8x384xf32, #tpu.memory_space<vmem>>, %arg2: memref<256x256xf32, #tpu.memory_space<vmem>>, %arg3: memref<384x256xf32, #tpu.memory_space<vmem>>, %arg4: memref<64x64xf32, #tpu.memory_space<vmem>>, %arg5: memref<64x64xf32, #tpu.memory_space<vmem>>, %arg6: memref<1x384xf32, #tpu.memory_space<vmem>>, %arg7: memref<8x128xf32, #tpu.memory_space<vmem>>, %arg8: memref<8x512xf32, #tpu.memory_space<vmem>>) attributes {dimension_semantics = [#tpu.dimension_semantics<parallel>], iteration_bounds = array<i64: 1>, scalar_prefetch = 0 : i64, scratch_operands = 1 : i64, tpu.core_type = #tpu.core_type<tc>, window_params = [{transform_indices = @transform_0, window_bounds = array<i64: 8, 384>}, {pipeline_mode = #tpu.pipeline_mode<synchronous>, transform_indices = @transform_1, window_bounds = array<i64: 256, 256>}, {pipeline_mode = #tpu.pipeline_mode<synchronous>, transform_indices = @transform_2, window_bounds = array<i64: 384, 256>}, {pipeline_mode = #tpu.pipeline_mode<synchronous>, transform_indices = @transform_3, window_bounds = array<i64: 64, 64>}, {pipeline_mode = #tpu.pipeline_mode<synchronous>, transform_indices = @transform_4, window_bounds = array<i64: 64, 64>}, {pipeline_mode = #tpu.pipeline_mode<synchronous>, transform_indices = @transform_5, window_bounds = array<i64: 1, 384>}, {transform_indices = @transform_6, window_bounds = array<i64: 8, 128>}]} {
    %c0 = arith.constant 0 : index
    %c0_0 = arith.constant 0 : index
    %0 = vector.load %arg2[%c0, %c0_0] : memref<256x256xf32, #tpu.memory_space<vmem>>, vector<256x256xf32>
    %c0_1 = arith.constant 0 : index
    %c0_2 = arith.constant 0 : index
    %1 = vector.load %arg3[%c0_1, %c0_2] : memref<384x256xf32, #tpu.memory_space<vmem>>, vector<384x256xf32>
    %c0_3 = arith.constant 0 : index
    %c0_4 = arith.constant 0 : index
    %2 = vector.load %arg6[%c0_3, %c0_4] : memref<1x384xf32, #tpu.memory_space<vmem>>, vector<1x128xf32>
    %3 = vector.shape_cast %2 : vector<1x128xf32> to vector<1x128xf32>
    %4 = vector.broadcast %3 : vector<1x128xf32> to vector<8x128xf32>
    %c0_5 = arith.constant 0 : index
    %c128 = arith.constant 128 : index
    %5 = vector.load %arg6[%c0_5, %c128] : memref<1x384xf32, #tpu.memory_space<vmem>>, vector<1x128xf32>
    %6 = vector.shape_cast %5 : vector<1x128xf32> to vector<1x128xf32>
    %7 = vector.broadcast %6 : vector<1x128xf32> to vector<8x128xf32>
    %c0_6 = arith.constant 0 : index
    %c256 = arith.constant 256 : index
    %8 = vector.load %arg6[%c0_6, %c256] : memref<1x384xf32, #tpu.memory_space<vmem>>, vector<1x64xf32>
    %c0_7 = arith.constant 0 : index
    %c320 = arith.constant 320 : index
    %9 = vector.load %arg6[%c0_7, %c320] : memref<1x384xf32, #tpu.memory_space<vmem>>, vector<1x64xf32>
    %cst = arith.constant 0.000000e+00 : f32
    %10 = vector.broadcast %cst : f32 to vector<8x128xf32>
    %c0_8 = arith.constant 0 : index
    %c0_9 = arith.constant 0 : index
    %11 = vector.load %arg8[%c0_8, %c0_9] : memref<8x512xf32, #tpu.memory_space<vmem>>, vector<8x128xf32>
    tpu.vector_store %arg8[%c0_8, %c0_9], %10 {strides = array<i32>} : memref<8x512xf32, #tpu.memory_space<vmem>>, vector<8x128xf32>,
    %cst_10 = arith.constant 0.000000e+00 : f32
    %12 = vector.broadcast %cst_10 : f32 to vector<8x128xf32>
    %c0_11 = arith.constant 0 : index
    %c384 = arith.constant 384 : index
    %13 = vector.load %arg8[%c0_11, %c384] : memref<8x512xf32, #tpu.memory_space<vmem>>, vector<8x128xf32>
    tpu.vector_store %arg8[%c0_11, %c384], %12 {strides = array<i32>} : memref<8x512xf32, #tpu.memory_space<vmem>>, vector<8x128xf32>,
    %c0_12 = arith.constant 0 : index
    %c0_13 = arith.constant 0 : index
    %14 = vector.load %arg1[%c0_12, %c0_13] : memref<8x384xf32, #tpu.memory_space<vmem>>, vector<8x256xf32>
    %cst_14 = arith.constant dense<0.000000e+00> : vector<8x256xf32>
    %15 = tpu.matmul %14, %0, %cst_14 {dimension_numbers = #tpu.dot_dimension_numbers<[1], [0], [0], [1], [0, 0, 1, 1], [], []>} : vector<8x256xf32>, vector<256x256xf32>, vector<8x256xf32> -> vector<8x256xf32>
    %16 = vector.extract_strided_slice %15 {offsets = [0, 0], sizes = [8, 128], strides = [1, 1]} : vector<8x256xf32> to vector<8x128xf32>
    %17 = vector.extract_strided_slice %15 {offsets = [0, 128], sizes = [8, 128], strides = [1, 1]} : vector<8x256xf32> to vector<8x128xf32>
    %18 = arith.maximumf %16, %17 : vector<8x128xf32>
    %19 = arith.addf %18, %4 : vector<8x128xf32>
    %cst_15 = arith.constant 0.000000e+00 : f32
    %20 = vector.broadcast %cst_15 : f32 to vector<8x128xf32>
    %21 = arith.maximumf %19, %20 : vector<8x128xf32>
    %c0_16 = arith.constant 0 : index
    %c128_17 = arith.constant 128 : index
    %22 = vector.load %arg8[%c0_16, %c128_17] : memref<8x512xf32, #tpu.memory_space<vmem>>, vector<8x128xf32>
    tpu.vector_store %arg8[%c0_16, %c128_17], %21 {strides = array<i32>} : memref<8x512xf32, #tpu.memory_space<vmem>>, vector<8x128xf32>,
    %c0_18 = arith.constant 0 : index
    %c128_19 = arith.constant 128 : index
    %23 = vector.load %arg1[%c0_18, %c128_19] : memref<8x384xf32, #tpu.memory_space<vmem>>, vector<8x256xf32>
    %cst_20 = arith.constant dense<0.000000e+00> : vector<8x256xf32>
    %24 = tpu.matmul %23, %0, %cst_20 {dimension_numbers = #tpu.dot_dimension_numbers<[1], [0], [0], [1], [0, 0, 1, 1], [], []>} : vector<8x256xf32>, vector<256x256xf32>, vector<8x256xf32> -> vector<8x256xf32>
    %25 = vector.extract_strided_slice %24 {offsets = [0, 0], sizes = [8, 128], strides = [1, 1]} : vector<8x256xf32> to vector<8x128xf32>
    %26 = vector.extract_strided_slice %24 {offsets = [0, 128], sizes = [8, 128], strides = [1, 1]} : vector<8x256xf32> to vector<8x128xf32>
    %27 = arith.maximumf %25, %26 : vector<8x128xf32>
    %28 = arith.addf %27, %4 : vector<8x128xf32>
    %cst_21 = arith.constant 0.000000e+00 : f32
    %29 = vector.broadcast %cst_21 : f32 to vector<8x128xf32>
    %30 = arith.maximumf %28, %29 : vector<8x128xf32>
    %c0_22 = arith.constant 0 : index
    %c256_23 = arith.constant 256 : index
    %31 = vector.load %arg8[%c0_22, %c256_23] : memref<8x512xf32, #tpu.memory_space<vmem>>, vector<8x128xf32>
    tpu.vector_store %arg8[%c0_22, %c256_23], %30 {strides = array<i32>} : memref<8x512xf32, #tpu.memory_space<vmem>>, vector<8x128xf32>,
    %cst_24 = arith.constant 0.000000e+00 : f32
    %32 = vector.broadcast %cst_24 : f32 to vector<8x128xf32>
    %c0_25 = arith.constant 0 : index
    %c0_26 = arith.constant 0 : index
    %33 = vector.load %arg8[%c0_25, %c0_26] : memref<8x512xf32, #tpu.memory_space<vmem>>, vector<8x384xf32>
    %cst_27 = arith.constant dense<0.000000e+00> : vector<8x256xf32>
    %34 = tpu.matmul %33, %1, %cst_27 {dimension_numbers = #tpu.dot_dimension_numbers<[1], [0], [0], [1], [0, 0, 1, 1], [], []>} : vector<8x384xf32>, vector<384x256xf32>, vector<8x256xf32> -> vector<8x256xf32>
    %35 = vector.extract_strided_slice %34 {offsets = [0, 0], sizes = [8, 128], strides = [1, 1]} : vector<8x256xf32> to vector<8x128xf32>
    %36 = vector.extract_strided_slice %34 {offsets = [0, 128], sizes = [8, 128], strides = [1, 1]} : vector<8x256xf32> to vector<8x128xf32>
    %37 = arith.maximumf %35, %36 : vector<8x128xf32>
    %38 = arith.addf %37, %7 : vector<8x128xf32>
    %cst_28 = arith.constant 0.000000e+00 : f32
    %39 = vector.broadcast %cst_28 : f32 to vector<8x128xf32>
    %40 = arith.maximumf %38, %39 : vector<8x128xf32>
    %41 = arith.addf %32, %40 : vector<8x128xf32>
    %c0_29 = arith.constant 0 : index
    %c128_30 = arith.constant 128 : index
    %42 = vector.load %arg8[%c0_29, %c128_30] : memref<8x512xf32, #tpu.memory_space<vmem>>, vector<8x384xf32>
    %cst_31 = arith.constant dense<0.000000e+00> : vector<8x256xf32>
    %43 = tpu.matmul %42, %1, %cst_31 {dimension_numbers = #tpu.dot_dimension_numbers<[1], [0], [0], [1], [0, 0, 1, 1], [], []>} : vector<8x384xf32>, vector<384x256xf32>, vector<8x256xf32> -> vector<8x256xf32>
    %44 = vector.extract_strided_slice %43 {offsets = [0, 0], sizes = [8, 128], strides = [1, 1]} : vector<8x256xf32> to vector<8x128xf32>
    %45 = vector.extract_strided_slice %43 {offsets = [0, 128], sizes = [8, 128], strides = [1, 1]} : vector<8x256xf32> to vector<8x128xf32>
    %46 = arith.maximumf %44, %45 : vector<8x128xf32>
    %47 = arith.addf %46, %7 : vector<8x128xf32>
    %cst_32 = arith.constant 0.000000e+00 : f32
    %48 = vector.broadcast %cst_32 : f32 to vector<8x128xf32>
    %49 = arith.maximumf %47, %48 : vector<8x128xf32>
    %50 = arith.addf %41, %49 : vector<8x128xf32>
    %51 = vector.extract_strided_slice %50 {offsets = [0, 0], sizes = [8, 64], strides = [1, 1]} : vector<8x128xf32> to vector<8x64xf32>
    %52 = vector.extract_strided_slice %50 {offsets = [0, 64], sizes = [8, 64], strides = [1, 1]} : vector<8x128xf32> to vector<8x64xf32>
    %53 = arith.addf %51, %52 : vector<8x64xf32>
    %cst_33 = arith.constant 2.500000e-01 : f32
    %54 = vector.broadcast %cst_33 : f32 to vector<8x64xf32>
    %55 = arith.mulf %53, %54 : vector<8x64xf32>
    %c0_34 = arith.constant 0 : index
    %c0_35 = arith.constant 0 : index
    %56 = vector.load %arg4[%c0_34, %c0_35] : memref<64x64xf32, #tpu.memory_space<vmem>>, vector<64x64xf32>
    %cst_36 = arith.constant dense<0.000000e+00> : vector<8x64xf32>
    %57 = tpu.matmul %55, %56, %cst_36 {dimension_numbers = #tpu.dot_dimension_numbers<[1], [0], [0], [1], [0, 0, 1, 1], [], []>} : vector<8x64xf32>, vector<64x64xf32>, vector<8x64xf32> -> vector<8x64xf32>
    %58 = vector.broadcast %8 : vector<1x64xf32> to vector<8x64xf32>
    %59 = arith.addf %57, %58 : vector<8x64xf32>
    %cst_37 = arith.constant 0.000000e+00 : f32
    %60 = vector.broadcast %cst_37 : f32 to vector<8x64xf32>
    %61 = arith.maximumf %59, %60 : vector<8x64xf32>
    %c0_38 = arith.constant 0 : index
    %c0_39 = arith.constant 0 : index
    %62 = vector.load %arg5[%c0_38, %c0_39] : memref<64x64xf32, #tpu.memory_space<vmem>>, vector<64x64xf32>
    %cst_40 = arith.constant dense<0.000000e+00> : vector<8x64xf32>
    %63 = tpu.matmul %61, %62, %cst_40 {dimension_numbers = #tpu.dot_dimension_numbers<[1], [0], [0], [1], [0, 0, 1, 1], [], []>} : vector<8x64xf32>, vector<64x64xf32>, vector<8x64xf32> -> vector<8x64xf32>
    %64 = vector.broadcast %9 : vector<1x64xf32> to vector<8x64xf32>
    %65 = arith.addf %63, %64 : vector<8x64xf32>
    %66 = tpu.concatenate %55, %65 in 1 : vector<8x64xf32>, vector<8x64xf32> -> vector<8x128xf32>
    %c0_41 = arith.constant 0 : index
    %c0_42 = arith.constant 0 : index
    %67 = vector.load %arg7[%c0_41, %c0_42] : memref<8x128xf32, #tpu.memory_space<vmem>>, vector<8x128xf32>
    tpu.vector_store %arg7[%c0_41, %c0_42], %66 {strides = array<i32>} : memref<8x128xf32, #tpu.memory_space<vmem>>, vector<8x128xf32>,
    return
  }
  func.func @transform_0(%arg0: i32) -> (i32, i32) {
    %c0_i32 = arith.constant 0 : i32
    %c0_i32_0 = arith.constant 0 : i32
    return %arg0, %c0_i32 : i32, i32
  }
  func.func @transform_1(%arg0: i32) -> (i32, i32) {
    %c0_i32 = arith.constant 0 : i32
    %c0_i32_0 = arith.constant 0 : i32
    %c0_i32_1 = arith.constant 0 : i32
    return %c0_i32, %c0_i32_0 : i32, i32
  }
  func.func @transform_2(%arg0: i32) -> (i32, i32) {
    %c0_i32 = arith.constant 0 : i32
    %c0_i32_0 = arith.constant 0 : i32
    %c0_i32_1 = arith.constant 0 : i32
    return %c0_i32, %c0_i32_0 : i32, i32
  }
  func.func @transform_3(%arg0: i32) -> (i32, i32) {
    %c0_i32 = arith.constant 0 : i32
    %c0_i32_0 = arith.constant 0 : i32
    %c0_i32_1 = arith.constant 0 : i32
    return %c0_i32, %c0_i32_0 : i32, i32
  }
  func.func @transform_4(%arg0: i32) -> (i32, i32) {
    %c0_i32 = arith.constant 0 : i32
    %c0_i32_0 = arith.constant 0 : i32
    %c0_i32_1 = arith.constant 0 : i32
    return %c0_i32, %c0_i32_0 : i32, i32
  }
  func.func @transform_5(%arg0: i32) -> (i32, i32) {
    %c0_i32 = arith.constant 0 : i32
    %c0_i32_0 = arith.constant 0 : i32
    %c0_i32_1 = arith.constant 0 : i32
    return %c0_i32, %c0_i32_0 : i32, i32
  }
  func.func @transform_6(%arg0: i32) -> (i32, i32) {
    %c0_i32 = arith.constant 0 : i32
    %c0_i32_0 = arith.constant 0 : i32
    return %arg0, %c0_i32 : i32, i32
  }
}

</mosaic_0001>

<bundles_post_ra>
// kernel: tpu_custom_call.1
= control target key start
LH: loop header
LB: loop body
LE: loop exit
PB: predicated region body
PF: predicated region fallthrough
CT: control target
= control target key end

     0   :  { %11 = vsyncpa [#allocation4], 0  ;;  %s1697_s0 = inlined_call_operand.hbm [shape: f32[8,384], index: 0, kind: input, shape index: {}]   ;;  %s1698_s1 = inlined_call_operand.hbm [shape: f32[256,256], index: 1, kind: input, shape index: {}]   ;;  %s1699_s2 = inlined_call_operand.hbm [shape: f32[384,256], index: 2, kind: input, shape index: {}]   ;;  %s1700_s3 = inlined_call_operand.hbm [shape: f32[64,64], index: 3, kind: input, shape index: {}]   ;;  %s1701_s4 = inlined_call_operand.hbm [shape: f32[64,64], index: 4, kind: input, shape index: {}]   ;;  %s1702_s5 = inlined_call_operand.vmem [shape: f32[1,384], index: 5, kind: input, shape index: {}]   ;;  %s1703_s6 = inlined_call_operand.hbm [shape: f32[8,128], index: 6, kind: output, shape index: {}]  }
   0x1   :  { %12 = vsyncpa [#allocation7], 0 }
   0x2   :  { %13 = vsyncpa [#allocation10], 0  ;;  %s30_s23 = sshll.u32 %s1698_s1, 4  ;;  %s31_s23 = int_to_ptr.hbm [resolvable:$true] %s30_s23 }
   0x3   :  { %14 = vsyncpa [#allocation5], 0  ;;  %s967_s24 = smov [#allocation6]   ;;  %s56_s28 = sshll.u32 %s1700_s3, 4  ;;  %s57_s28 = int_to_ptr.hbm [resolvable:$true] %s56_s28 }
   0x4   :  { %s32_s25 = sshll.u32 %s967_s24, 4  ;;  %s968_s29 = smov 256   ;;  %s33_s25 = int_to_ptr.vmem [resolvable:$true] %s32_s25 }
   0x5   :  { %s969_s30 = smov 16   ;;  %s970_s7 = smov [#allocation9]  }
   0x6   :  { %38 = dma.hbm_to_vmem [thread:$0]  %s31_s23, 8192, %s33_s25, [#allocation7], %s968_s29, %s968_s29, %s969_s30  }
   0x7   :  { %s58_s8 = sshll.u32 %s970_s7, 4  ;;  %s971_s9 = smov 128   ;;  %s59_s8 = int_to_ptr.vmem [resolvable:$true] %s58_s8 }
   0x8   :  { %s972_s10 = smov 8   ;;  %s20_s12 = sshll.u32 %s1697_s0, 4  ;;  %s21_s12 = int_to_ptr.hbm [resolvable:$true] %s20_s12 }
   0x9   :  { %64 = dma.hbm_to_vmem [thread:$0]  %s57_s28, 1024, %s59_s8, [#allocation10], %s971_s9, %s971_s9, %s972_s10  }
   0xa   :  { %s973_s13 = smov [#allocation3]   ;;  %s43_s16 = sshll.u32 %s1699_s2, 4  ;;  %s44_s16 = int_to_ptr.hbm [resolvable:$true] %s43_s16 }
   0xb   :  { %s22_s14 = sshll.u32 %s973_s13, 4  ;;  %s974_s17 = smov [#allocation8]   ;;  %s23_s14 = int_to_ptr.vmem [resolvable:$true] %s22_s14 }
   0xc   :  { %25 = dma.hbm_to_vmem [thread:$0]  %s21_s12, 384, %s23_s14, [#allocation4]  }
   0xd   :  { %s45_s18 = sshll.u32 %s974_s17, 4  ;;  %s69_s21 = sshll.u32 %s1701_s4, 4  ;;  %s46_s18 = int_to_ptr.vmem [resolvable:$true] %s45_s18  ;;  %s70_s21 = int_to_ptr.hbm [resolvable:$true] %s69_s21 }
   0xe   :  { %51 = dma.hbm_to_vmem [thread:$0]  %s44_s16, 12288, %s46_s18, [#allocation7], %s968_s29, %s968_s29, %s969_s30  }
   0xf   :  { %s975_s0 = smov [#allocation11]  }
  0x10   :  { %s71_s22 = sshll.u32 %s975_s0, 4  ;;  %s72_s22 = int_to_ptr.vmem [resolvable:$true] %s71_s22 }
  0x11   :  { %77 = dma.hbm_to_vmem [thread:$0]  %s70_s21, 1024, %s72_s22, [#allocation10], %s971_s9, %s971_s9, %s972_s10  }
  0x12   :  { %959 = dma.done.wait [#allocation4], 384  }
  0x13   :  { %960 = vsyncadd [#allocation4], 4294966912 }
  0x14   :  { %961 = dma.done.wait [#allocation7], 20480  }
  0x15   :  { %962 = vsyncadd [#allocation7], 4294946816 }
  0x16   :  { %963 = dma.done.wait [#allocation10], 2048  }
  0x17   :  { %964 = vsyncadd [#allocation10], 4294965248  ;;  %v1029_v0 = vld [vmem:[#allocation6 + $0xf8] sm:$0xff]  ;;  %v1033_v2 = vld [vmem:[#allocation6 + $0xe8] sm:$0xff]  ;;  %s977_s25 = smov 64   ;;  %vm714_vm0 = vcmask 523264  }
  0x18   :  { %v1031_v1 = vld [vmem:[#allocation6 + $0x1f8] sm:$0xff]  ;;  %313 = vmatpush.msra.mxu2 %v1029_v0  ;;  %v1037_v3 = vld [vmem:[#allocation6 + $0x1e8] sm:$0xff]  ;;  %v1043_v6 = vld [vmem:[#allocation6 + $0xf0] sm:$0xff]  ;;  %s786_s7 = sshll.u32 %s1703_s6, 4  ;;  %s787_s7 = int_to_ptr.hbm [resolvable:$true] %s786_s7 }
  0x19   :  { %333 = vmatpush.msra.mxu3 %v1031_v1  ;;  %v1039_v4 = vld [vmem:[#allocation6 + $0xd8] sm:$0xff]  ;;  %v1045_v7 = vld [vmem:[#allocation6 + $0x1f0] sm:$0xff]  ;;  %v1049_v8 = vld [vmem:[#allocation6 + $0xe0] sm:$0xff]  ;;  %273 = vmatpush.msra.mxu0 %v1043_v6 }
  0x1a   :  { %v1041_v5 = vld [vmem:[#allocation6 + $0x1d8] sm:$0xff]  ;;  %314 = vmatpush.msra.mxu2 %v1033_v2  ;;  %v1051_v9 = vld [vmem:[#allocation6 + $0x1e0] sm:$0xff]  ;;  %293 = vmatpush.msra.mxu1 %v1045_v7  ;;  %v1055_v10 = vld [vmem:[#allocation6 + $0xc8] sm:$0xff] }
  0x1b   :  { %334 = vmatpush.msra.mxu3 %v1037_v3  ;;  %v1057_v11 = vld [vmem:[#allocation6 + $0x1c8] sm:$0xff]  ;;  %v1061_v12 = vld [vmem:[#allocation6 + $0xd0] sm:$0xff]  ;;  %274 = vmatpush.msra.mxu0 %v1049_v8  ;;  %v1067_v14 = vld [vmem:[#allocation6 + $0xb8] sm:$0xff] }
  0x1c   :  { %315 = vmatpush.msra.mxu2 %v1039_v4  ;;  %v1063_v13 = vld [vmem:[#allocation6 + $0x1d0] sm:$0xff]  ;;  %294 = vmatpush.msra.mxu1 %v1051_v9  ;;  %v1069_v15 = vld [vmem:[#allocation6 + $0x1b8] sm:$0xff]  ;;  %v1073_v16 = vld [vmem:[#allocation6 + $0xc0] sm:$0xff] }
  0x1d   :  { %335 = vmatpush.msra.mxu3 %v1041_v5  ;;  %v1075_v17 = vld [vmem:[#allocation6 + $0x1c0] sm:$0xff]  ;;  %275 = vmatpush.msra.mxu0 %v1061_v12  ;;  %v1079_v18 = vld [vmem:[#allocation6 + $0xa8] sm:$0xff]  ;;  %v1085_v20 = vld [vmem:[#allocation6 + $0xb0] sm:$0xff] }
  0x1e   :  { %316 = vmatpush.msra.mxu2 %v1055_v10  ;;  %295 = vmatpush.msra.mxu1 %v1063_v13  ;;  %v1081_v19 = vld [vmem:[#allocation6 + $0x1a8] sm:$0xff]  ;;  %v1087_v21 = vld [vmem:[#allocation6 + $0x1b0] sm:$0xff]  ;;  %v1091_v22 = vld [vmem:[#allocation6 + $0x98] sm:$0xff] }
  0x1f   :  { %336 = vmatpush.msra.mxu3 %v1057_v11  ;;  %276 = vmatpush.msra.mxu0 %v1073_v16  ;;  %v1093_v23 = vld [vmem:[#allocation6 + $0x198] sm:$0xff]  ;;  %v1097_v24 = vld [vmem:[#allocation6 + $0xa0] sm:$0xff]  ;;  %v1103_v26 = vld [vmem:[#allocation6 + $0x88] sm:$0xff] }
  0x20   :  { %317 = vmatpush.msra.mxu2 %v1067_v14  ;;  %296 = vmatpush.msra.mxu1 %v1075_v17  ;;  %v1099_v25 = vld [vmem:[#allocation6 + $0x1a0] sm:$0xff]  ;;  %v1105_v27 = vld [vmem:[#allocation6 + $0x188] sm:$0xff]  ;;  %v1109_v28 = vld [vmem:[#allocation6 + $0x90] sm:$0xff] }
  0x21   :  { %337 = vmatpush.msra.mxu3 %v1069_v15  ;;  %277 = vmatpush.msra.mxu0 %v1085_v20  ;;  %v1111_v29 = vld [vmem:[#allocation6 + $0x190] sm:$0xff]  ;;  %v1115_v30 = vld [vmem:[#allocation6 + $0x78] sm:$0xff]  ;;  %v1121_v32 = vld [vmem:[#allocation6 + $0x80] sm:$0xff] }
  0x22   :  { %318 = vmatpush.msra.mxu2 %v1079_v18  ;;  %297 = vmatpush.msra.mxu1 %v1087_v21  ;;  %v1117_v31 = vld [vmem:[#allocation6 + $0x178] sm:$0xff]  ;;  %v1123_v33 = vld [vmem:[#allocation6 + $0x180] sm:$0xff]  ;;  %v1127_v34 = vld [vmem:[#allocation6 + $0x68] sm:$0xff] }
  0x23   :  { %338 = vmatpush.msra.mxu3 %v1081_v19  ;;  %278 = vmatpush.msra.mxu0 %v1097_v24  ;;  %v1129_v35 = vld [vmem:[#allocation6 + $0x168] sm:$0xff]  ;;  %v1133_v36 = vld [vmem:[#allocation6 + $0x70] sm:$0xff]  ;;  %v1139_v38 = vld [vmem:[#allocation6 + $0x58] sm:$0xff] }
  0x24   :  { %319 = vmatpush.msra.mxu2 %v1091_v22  ;;  %298 = vmatpush.msra.mxu1 %v1099_v25  ;;  %v1135_v37 = vld [vmem:[#allocation6 + $0x170] sm:$0xff]  ;;  %v1141_v39 = vld [vmem:[#allocation6 + $0x158] sm:$0xff]  ;;  %v1145_v40 = vld [vmem:[#allocation6 + $0x60] sm:$0xff] }
  0x25   :  { %339 = vmatpush.msra.mxu3 %v1093_v23  ;;  %279 = vmatpush.msra.mxu0 %v1109_v28  ;;  %v1147_v41 = vld [vmem:[#allocation6 + $0x160] sm:$0xff]  ;;  %v1151_v42 = vld [vmem:[#allocation6 + $0x48] sm:$0xff]  ;;  %v1155_v44 = vld [vmem:[#allocation6 + $0x38] sm:$0xff] }
  0x26   :  { %320 = vmatpush.msra.mxu2 %v1103_v26  ;;  %299 = vmatpush.msra.mxu1 %v1111_v29  ;;  %v1153_v43 = vld [vmem:[#allocation6 + $0x148] sm:$0xff]  ;;  %v1159_v45 = vld [vmem:[#allocation6 + $0x138] sm:$0xff]  ;;  %v1161_v46 = vld [vmem:[#allocation6 + $0x50] sm:$0xff] }
  0x27   :  { %340 = vmatpush.msra.mxu3 %v1105_v27  ;;  %280 = vmatpush.msra.mxu0 %v1121_v32  ;;  %v1163_v47 = vld [vmem:[#allocation6 + $0x150] sm:$0xff]  ;;  %v1169_v48 = vld [vmem:[#allocation6 + $0x40] sm:$0xff]  ;;  %v1175_v50 = vld [vmem:[#allocation6 + $0x28] sm:$0xff] }
  0x28   :  { %321 = vmatpush.msra.mxu2 %v1115_v30  ;;  %300 = vmatpush.msra.mxu1 %v1123_v33  ;;  %v1171_v49 = vld [vmem:[#allocation6 + $0x140] sm:$0xff]  ;;  %v1177_v51 = vld [vmem:[#allocation6 + $0x128] sm:$0xff]  ;;  %v1181_v52 = vld [vmem:[#allocation6 + $0x30] sm:$0xff] }
  0x29   :  { %341 = vmatpush.msra.mxu3 %v1117_v31  ;;  %281 = vmatpush.msra.mxu0 %v1133_v36  ;;  %v1183_v53 = vld [vmem:[#allocation6 + $0x130] sm:$0xff]  ;;  %v1187_v54 = vld [vmem:[#allocation6 + $0x18] sm:$0xff]  ;;  %v1193_v56 = vld [vmem:[#allocation6 + $0x20] sm:$0xff] }
  0x2a   :  { %322 = vmatpush.msra.mxu2 %v1127_v34  ;;  %301 = vmatpush.msra.mxu1 %v1135_v37  ;;  %v1189_v55 = vld [vmem:[#allocation6 + $0x118] sm:$0xff]  ;;  %v1195_v57 = vld [vmem:[#allocation6 + $0x120] sm:$0xff]  ;;  %v1199_v58 = vld [vmem:[#allocation6 + $0x8] sm:$0xff] }
  0x2b   :  { %342 = vmatpush.msra.mxu3 %v1129_v35  ;;  %282 = vmatpush.msra.mxu0 %v1145_v40  ;;  %v1201_v59 = vld [vmem:[#allocation6 + $0x108] sm:$0xff]  ;;  %v1207_v60 = vld [vmem:[#allocation6 + $0x10] sm:$0xff]  ;;  %v1215_v62 = vld [vmem:[#allocation6] sm:$0xff] }
  0x2c   :  { %323 = vmatpush.msra.mxu2 %v1139_v38  ;;  %302 = vmatpush.msra.mxu1 %v1147_v41  ;;  %v1209_v61 = vld [vmem:[#allocation6 + $0x110] sm:$0xff]  ;;  %v1217_v63 = vld [vmem:[#allocation6 + $0x100] sm:$0xff] }
  0x2d   :  { %343 = vmatpush.msra.mxu3 %v1141_v39  ;;  %283 = vmatpush.msra.mxu0 %v1161_v46 }
  0x2e   :  { %324 = vmatpush.msra.mxu2 %v1151_v42  ;;  %303 = vmatpush.msra.mxu1 %v1163_v47 }
  0x2f   :  { %344 = vmatpush.msra.mxu3 %v1153_v43  ;;  %284 = vmatpush.msra.mxu0 %v1169_v48 }
  0x30   :  { %325 = vmatpush.msra.mxu2 %v1155_v44  ;;  %304 = vmatpush.msra.mxu1 %v1171_v49 }
  0x31   :  { %345 = vmatpush.msra.mxu3 %v1159_v45  ;;  %285 = vmatpush.msra.mxu0 %v1181_v52 }
  0x32   :  { %326 = vmatpush.msra.mxu2 %v1175_v50  ;;  %305 = vmatpush.msra.mxu1 %v1183_v53 }
  0x33   :  { %346 = vmatpush.msra.mxu3 %v1177_v51  ;;  %286 = vmatpush.msra.mxu0 %v1193_v56 }
  0x34   :  { %327 = vmatpush.msra.mxu2 %v1187_v54  ;;  %306 = vmatpush.msra.mxu1 %v1195_v57 }
  0x35   :  { %347 = vmatpush.msra.mxu3 %v1189_v55  ;;  %287 = vmatpush.msra.mxu0 %v1207_v60 }
  0x36   :  { %328 = vmatpush.msra.mxu2 %v1199_v58  ;;  %307 = vmatpush.msra.mxu1 %v1209_v61 }
  0x37   :  { %348 = vmatpush.msra.mxu3 %v1201_v59  ;;  %288 = vmatpush.msra.mxu0 %v1215_v62 }
  0x38   :  { %399 = vmatpush.msrb.mxu2 %v1029_v0  ;;  %308 = vmatpush.msra.mxu1 %v1217_v63  ;;  %v271_v0 = vld [vmem:[#allocation3] sm:$0xff] }
  0x39   :  { %419 = vmatpush.msrb.mxu3 %v1031_v1  ;;  %v1227_v1 = vld [vmem:[#allocation3 + $0x8] sm:$0xff]  ;;  %359 = vmatpush.msrb.mxu0 %v1043_v6  ;;  %v1292_v6 = vld [vmem:[#allocation8 + $0xe8] sm:$0xff] }
  0x3a   :  { %400 = vmatpush.msrb.mxu2 %v1033_v2  ;;  %379 = vmatpush.msrb.mxu1 %v1045_v7  ;;  %v358_v2 = vld [vmem:[#allocation3 + $0x10] sm:$0xff]  ;;  %v1298_v7 = vld [vmem:[#allocation8 + $0x1f0] sm:$0xff] }
  0x3b   :  { %420 = vmatpush.msrb.mxu3 %v1037_v3  ;;  %329 = vmatmul.f32.vlgmr.msra.gmra.mxu2 %v271_v0  ;;  %v1283_v3 = vld [vmem:[#allocation8 + $0x2f0] sm:$0xff] }
  0x3c   :  { %401 = vmatpush.msrb.mxu2 %v1039_v4  ;;  %349 = vmatmul.f32.vlgmr.msra.gmra.mxu3 %v1227_v1  ;;  %v1285_v4 = vld [vmem:[#allocation8 + $0xf8] sm:$0xff] }
  0x3d   :  { %421 = vmatpush.msrb.mxu3 %v1041_v5  ;;  %360 = vmatpush.msrb.mxu0 %v1049_v8  ;;  %v1290_v5 = vld [vmem:[#allocation8 + $0x2e0] sm:$0xff]  ;;  %v1300_v8 = vld [vmem:[#allocation8 + $0xf0] sm:$0xff] }
  0x3e   :  { %402 = vmatpush.msrb.mxu2 %v1055_v10  ;;  %380 = vmatpush.msrb.mxu1 %v1051_v9  ;;  %v1306_v9 = vld [vmem:[#allocation8 + $0x2d0] sm:$0xff]  ;;  %v1308_v10 = vld [vmem:[#allocation8 + $0xd8] sm:$0xff] }
  0x3f   :  { %422 = vmatpush.msrb.mxu3 %v1057_v11  ;;  %361 = vmatpush.msrb.mxu0 %v1061_v12  ;;  %v1311_v11 = vld [vmem:[#allocation8 + $0x1e0] sm:$0xff] }
  0x40   :  { %403 = vmatpush.msrb.mxu2 %v1067_v14  ;;  %381 = vmatpush.msrb.mxu1 %v1063_v13  ;;  %v1313_v12 = vld [vmem:[#allocation8 + $0xe0] sm:$0xff]  ;;  %v1319_v14 = vld [vmem:[#allocation8 + $0xc8] sm:$0xff] }
  0x41   :  { %423 = vmatpush.msrb.mxu3 %v1069_v15  ;;  %362 = vmatpush.msrb.mxu0 %v1073_v16  ;;  %v1317_v13 = vld [vmem:[#allocation8 + $0x2c0] sm:$0xff]  ;;  %v1321_v15 = vld [vmem:[#allocation8 + $0x1d0] sm:$0xff] }
  0x42   :  { %404 = vmatpush.msrb.mxu2 %v1079_v18  ;;  %382 = vmatpush.msrb.mxu1 %v1075_v17  ;;  %v1323_v16 = vld [vmem:[#allocation8 + $0xd0] sm:$0xff]  ;;  %v1331_v18 = vld [vmem:[#allocation8 + $0xb8] sm:$0xff] }
  0x43   :  { %424 = vmatpush.msrb.mxu3 %v1081_v19  ;;  %289 = vmatmul.f32.vlgmr.msra.gmra.mxu0 %v271_v0  ;;  %v1329_v17 = vld [vmem:[#allocation8 + $0x2b0] sm:$0xff]  ;;  %1730 = vst [vmem:[#allocation17_spill] sm:$0xff] %v1331_v18  ;;  %v1333_v19 = vld [vmem:[#allocation8 + $0x1c0] sm:$0xff] }
  0x44   :  { %405 = vmatpush.msrb.mxu2 %v1091_v22  ;;  %309 = vmatmul.f32.vlgmr.msra.gmra.mxu1 %v1227_v1  ;;  %v1343_v22 = vld [vmem:[#allocation8 + $0xa8] sm:$0xff]  ;;  %v1471_v0 = vld [vmem:[#allocation8] sm:$0xff] }
  0x45   :  { %425 = vmatpush.msrb.mxu3 %v1093_v23  ;;  %363 = vmatpush.msrb.mxu0 %v1085_v20  ;;  %v1335_v20 = vld [vmem:[#allocation8 + $0xc0] sm:$0xff]  ;;  %1731 = vst [vmem:[#allocation18_spill] sm:$0xff] %v1343_v22  ;;  %v1345_v23 = vld [vmem:[#allocation8 + $0x1b0] sm:$0xff] }
  0x46   :  { %383 = vmatpush.msrb.mxu1 %v1087_v21  ;;  %406 = vmatpush.msrb.mxu2 %v1103_v26  ;;  %v1341_v21 = vld [vmem:[#allocation8 + $0x2a0] sm:$0xff]  ;;  %v1355_v26 = vld [vmem:[#allocation8 + $0x98] sm:$0xff] }
  0x47   :  { %426 = vmatpush.msrb.mxu3 %v1105_v27  ;;  %364 = vmatpush.msrb.mxu0 %v1097_v24  ;;  %v1347_v24 = vld [vmem:[#allocation8 + $0xb0] sm:$0xff]  ;;  %1732 = vst [vmem:[#allocation19_spill] sm:$0xff] %v1355_v26  ;;  %v1357_v27 = vld [vmem:[#allocation8 + $0x1a0] sm:$0xff] }
  0x48   :  { %384 = vmatpush.msrb.mxu1 %v1099_v25  ;;  %407 = vmatpush.msrb.mxu2 %v1115_v30  ;;  %v1353_v25 = vld [vmem:[#allocation8 + $0x290] sm:$0xff]  ;;  %v1367_v30 = vld [vmem:[#allocation8 + $0x88] sm:$0xff] }
  0x49   :  { %427 = vmatpush.msrb.mxu3 %v1117_v31  ;;  %365 = vmatpush.msrb.mxu0 %v1109_v28  ;;  %v1359_v28 = vld [vmem:[#allocation8 + $0xa0] sm:$0xff]  ;;  %1733 = vst [vmem:[#allocation20_spill] sm:$0xff] %v1367_v30  ;;  %v1369_v31 = vld [vmem:[#allocation8 + $0x190] sm:$0xff] }
  0x4a   :  { %385 = vmatpush.msrb.mxu1 %v1111_v29  ;;  %408 = vmatpush.msrb.mxu2 %v1127_v34  ;;  %v1365_v29 = vld [vmem:[#allocation8 + $0x280] sm:$0xff]  ;;  %v1379_v34 = vld [vmem:[#allocation8 + $0x78] sm:$0xff] }
  0x4b   :  { %428 = vmatpush.msrb.mxu3 %v1129_v35  ;;  %366 = vmatpush.msrb.mxu0 %v1121_v32  ;;  %v1371_v32 = vld [vmem:[#allocation8 + $0x90] sm:$0xff]  ;;  %1734 = vst [vmem:[#allocation21_spill] sm:$0xff] %v1379_v34  ;;  %v1381_v35 = vld [vmem:[#allocation8 + $0x180] sm:$0xff] }
  0x4c   :  { %386 = vmatpush.msrb.mxu1 %v1123_v33  ;;  %409 = vmatpush.msrb.mxu2 %v1139_v38  ;;  %v1377_v33 = vld [vmem:[#allocation8 + $0x270] sm:$0xff]  ;;  %v1391_v38 = vld [vmem:[#allocation8 + $0x68] sm:$0xff] }
  0x4d   :  { %429 = vmatpush.msrb.mxu3 %v1141_v39  ;;  %367 = vmatpush.msrb.mxu0 %v1133_v36  ;;  %v1383_v36 = vld [vmem:[#allocation8 + $0x80] sm:$0xff]  ;;  %1735 = vst [vmem:[#allocation22_spill] sm:$0xff] %v1391_v38  ;;  %v1393_v39 = vld [vmem:[#allocation8 + $0x170] sm:$0xff] }
  0x4e   :  { %387 = vmatpush.msrb.mxu1 %v1135_v37  ;;  %410 = vmatpush.msrb.mxu2 %v1151_v42  ;;  %v1389_v37 = vld [vmem:[#allocation8 + $0x260] sm:$0xff]  ;;  %v1403_v42 = vld [vmem:[#allocation8 + $0x58] sm:$0xff] }
  0x4f   :  { %430 = vmatpush.msrb.mxu3 %v1153_v43  ;;  %368 = vmatpush.msrb.mxu0 %v1145_v40  ;;  %v1395_v40 = vld [vmem:[#allocation8 + $0x70] sm:$0xff]  ;;  %1736 = vst [vmem:[#allocation23_spill] sm:$0xff] %v1403_v42  ;;  %v1405_v43 = vld [vmem:[#allocation8 + $0x160] sm:$0xff] }
  0x50   :  { %388 = vmatpush.msrb.mxu1 %v1147_v41  ;;  %411 = vmatpush.msrb.mxu2 %v1155_v44  ;;  %v1401_v41 = vld [vmem:[#allocation8 + $0x250] sm:$0xff]  ;;  %v1407_v44 = vld [vmem:[#allocation8 + $0x60] sm:$0xff] }
  0x51   :  { %431 = vmatpush.msrb.mxu3 %v1159_v45  ;;  %369 = vmatpush.msrb.mxu0 %v1161_v46  ;;  %v1413_v45 = vld [vmem:[#allocation8 + $0x240] sm:$0xff]  ;;  %v1415_v46 = vld [vmem:[#allocation8 + $0x48] sm:$0xff] }
  0x52   :  { %389 = vmatpush.msrb.mxu1 %v1163_v47  ;;  %412 = vmatpush.msrb.mxu2 %v1175_v50  ;;  %1737 = vst [vmem:[#allocation24_spill] sm:$0xff] %v1415_v46  ;;  %v1417_v47 = vld [vmem:[#allocation8 + $0x150] sm:$0xff]  ;;  %v1427_v50 = vld [vmem:[#allocation8 + $0x38] sm:$0xff] }
  0x53   :  { %432 = vmatpush.msrb.mxu3 %v1177_v51  ;;  %370 = vmatpush.msrb.mxu0 %v1169_v48  ;;  %v1419_v48 = vld [vmem:[#allocation8 + $0x50] sm:$0xff]  ;;  %1738 = vst [vmem:[#allocation25_spill] sm:$0xff] %v1427_v50  ;;  %v1429_v51 = vld [vmem:[#allocation8 + $0x140] sm:$0xff] }
  0x54   :  { %390 = vmatpush.msrb.mxu1 %v1171_v49  ;;  %413 = vmatpush.msrb.mxu2 %v1187_v54  ;;  %v1425_v49 = vld [vmem:[#allocation8 + $0x230] sm:$0xff]  ;;  %v1439_v54 = vld [vmem:[#allocation8 + $0x28] sm:$0xff] }
  0x55   :  { %433 = vmatpush.msrb.mxu3 %v1189_v55  ;;  %371 = vmatpush.msrb.mxu0 %v1181_v52  ;;  %v1431_v52 = vld [vmem:[#allocation8 + $0x40] sm:$0xff]  ;;  %1739 = vst [vmem:[#allocation26_spill] sm:$0xff] %v1439_v54  ;;  %v1441_v55 = vld [vmem:[#allocation8 + $0x130] sm:$0xff] }
  0x56   :  { %391 = vmatpush.msrb.mxu1 %v1183_v53  ;;  %414 = vmatpush.msrb.mxu2 %v1199_v58  ;;  %v1437_v53 = vld [vmem:[#allocation8 + $0x220] sm:$0xff]  ;;  %v1451_v58 = vld [vmem:[#allocation8 + $0x18] sm:$0xff] }
  0x57   :  { %434 = vmatpush.msrb.mxu3 %v1201_v59  ;;  %415 = vmatmul.f32.vlgmr.msrb.gmra.mxu2 %v1227_v1  ;;  %1741 = vst [vmem:[#allocation28_spill] sm:$0xff] %v1451_v58  ;;  %v1453_v59 = vld [vmem:[#allocation8 + $0x120] sm:$0xff] }
  0x58   :  { %435 = vmatmul.f32.vlgmr.msrb.gmra.mxu3 %v358_v2  ;;  %372 = vmatpush.msrb.mxu0 %v1193_v56  ;;  %v1443_v56 = vld [vmem:[#allocation8 + $0x30] sm:$0xff] }
  0x59   :  { %392 = vmatpush.msrb.mxu1 %v1195_v57  ;;  %486 = vmatpush.msra.mxu2 %v1283_v3  ;;  %v1449_v57 = vld [vmem:[#allocation8 + $0x210] sm:$0xff] }
  0x5a   :  { %506 = vmatpush.msra.mxu3 %v1285_v4  ;;  %373 = vmatpush.msrb.mxu0 %v1207_v60  ;;  %1740 = vst [vmem:[#allocation27_spill] sm:$0xff] %v1449_v57  ;;  %v1455_v60 = vld [vmem:[#allocation8 + $0x20] sm:$0xff] }
  0x5b   :  { %393 = vmatpush.msrb.mxu1 %v1209_v61  ;;  %487 = vmatpush.msra.mxu2 %v1290_v5  ;;  %v1461_v61 = vld [vmem:[#allocation8 + $0x110] sm:$0xff] }
  0x5c   :  { %507 = vmatpush.msra.mxu3 %v1292_v6  ;;  %374 = vmatpush.msrb.mxu0 %v1215_v62  ;;  %v1463_v62 = vld [vmem:[#allocation8 + $0x10] sm:$0xff] }
  0x5d   :  { %394 = vmatpush.msrb.mxu1 %v1217_v63  ;;  %375 = vmatmul.f32.vlgmr.msrb.gmra.mxu0 %v1227_v1  ;;  %v1469_v63 = vld [vmem:[#allocation8 + $0x100] sm:$0xff]  ;;  %v1474_v1 = vld [vmem:[#allocation8 + $0x2f8] sm:$0xff] }
  0x5e   :  { %395 = vmatmul.f32.vlgmr.msrb.gmra.mxu1 %v358_v2  ;;  %446 = vmatpush.msra.mxu0 %v1300_v8  ;;  %v1477_v2 = vld [vmem:[#allocation8 + $0x1f8] sm:$0xff] }
  0x5f   :  { %466 = vmatpush.msra.mxu1 %v1298_v7  ;;  %488 = vmatpush.msra.mxu2 %v1306_v9  ;;  %1742 = vst [vmem:[#allocation29_spill] sm:$0xff] %v1477_v2 }
  0x60   :  { %508 = vmatpush.msra.mxu3 %v1308_v10  ;;  %447 = vmatpush.msra.mxu0 %v1313_v12 }
  0x61   :  { %467 = vmatpush.msra.mxu1 %v1311_v11  ;;  %489 = vmatpush.msra.mxu2 %v1317_v13 }
  0x62   :  { %509 = vmatpush.msra.mxu3 %v1319_v14  ;;  %448 = vmatpush.msra.mxu0 %v1323_v16 }
  0x63   :  { %468 = vmatpush.msra.mxu1 %v1321_v15  ;;  %490 = vmatpush.msra.mxu2 %v1329_v17 }
  0x64   :  { %510 = vmatpush.msra.mxu3 %v1331_v18  ;;  %449 = vmatpush.msra.mxu0 %v1335_v20  ;;  %v1533_v18 = vld [vmem:[#allocation8 + $0x8] sm:$0xff] }
  0x65   :  { %469 = vmatpush.msra.mxu1 %v1333_v19  ;;  %491 = vmatpush.msra.mxu2 %v1341_v21  ;;  %1753 = vst [vmem:[#allocation40_spill] sm:$0xff] %v1533_v18 }
  0x66   :  { %511 = vmatpush.msra.mxu3 %v1343_v22  ;;  %450 = vmatpush.msra.mxu0 %v1347_v24  ;;  %v1513_v22 = vld [vmem:[#allocation8 + $0x198] sm:$0xff] }
  0x67   :  { %470 = vmatpush.msra.mxu1 %v1345_v23  ;;  %492 = vmatpush.msra.mxu2 %v1353_v25  ;;  %1748 = vst [vmem:[#allocation35_spill] sm:$0xff] %v1513_v22 }
  0x68   :  { %512 = vmatpush.msra.mxu3 %v1355_v26  ;;  %451 = vmatpush.msra.mxu0 %v1359_v28  ;;  %v1507_v26 = vld [vmem:[#allocation8 + $0x1a8] sm:$0xff] }
  0x69   :  { %471 = vmatpush.msra.mxu1 %v1357_v27  ;;  %493 = vmatpush.msra.mxu2 %v1365_v29  ;;  %1747 = vst [vmem:[#allocation34_spill] sm:$0xff] %v1507_v26 }
  0x6a   :  { %513 = vmatpush.msra.mxu3 %v1367_v30  ;;  %452 = vmatpush.msra.mxu0 %v1371_v32  ;;  %v1501_v30 = vld [vmem:[#allocation8 + $0x1b8] sm:$0xff] }
  0x6b   :  { %472 = vmatpush.msra.mxu1 %v1369_v31  ;;  %494 = vmatpush.msra.mxu2 %v1377_v33  ;;  %1746 = vst [vmem:[#allocation33_spill] sm:$0xff] %v1501_v30 }
  0x6c   :  { %514 = vmatpush.msra.mxu3 %v1379_v34  ;;  %453 = vmatpush.msra.mxu0 %v1383_v36  ;;  %v1499_v34 = vld [vmem:[#allocation8 + $0x2b8] sm:$0xff] }
  0x6d   :  { %473 = vmatpush.msra.mxu1 %v1381_v35  ;;  %495 = vmatpush.msra.mxu2 %v1389_v37 }
  0x6e   :  { %515 = vmatpush.msra.mxu3 %v1391_v38  ;;  %454 = vmatpush.msra.mxu0 %v1395_v40  ;;  %v1495_v38 = vld [vmem:[#allocation8 + $0x1c8] sm:$0xff] }
  0x6f   :  { %474 = vmatpush.msra.mxu1 %v1393_v39  ;;  %496 = vmatpush.msra.mxu2 %v1401_v41  ;;  %1745 = vst [vmem:[#allocation32_spill] sm:$0xff] %v1495_v38 }
  0x70   :  { %516 = vmatpush.msra.mxu3 %v1403_v42  ;;  %455 = vmatpush.msra.mxu0 %v1407_v44  ;;  %v1493_v42 = vld [vmem:[#allocation8 + $0x2c8] sm:$0xff] }
  0x71   :  { %475 = vmatpush.msra.mxu1 %v1405_v43  ;;  %497 = vmatpush.msra.mxu2 %v1413_v45 }
  0x72   :  { %517 = vmatpush.msra.mxu3 %v1415_v46  ;;  %456 = vmatpush.msra.mxu0 %v1419_v48  ;;  %v1489_v46 = vld [vmem:[#allocation8 + $0x1d8] sm:$0xff] }
  0x73   :  { %476 = vmatpush.msra.mxu1 %v1417_v47  ;;  %498 = vmatpush.msra.mxu2 %v1425_v49  ;;  %1744 = vst [vmem:[#allocation31_spill] sm:$0xff] %v1489_v46 }
  0x74   :  { %518 = vmatpush.msra.mxu3 %v1427_v50  ;;  %457 = vmatpush.msra.mxu0 %v1431_v52  ;;  %v1487_v50 = vld [vmem:[#allocation8 + $0x2d8] sm:$0xff] }
  0x75   :  { %477 = vmatpush.msra.mxu1 %v1429_v51  ;;  %499 = vmatpush.msra.mxu2 %v1437_v53 }
  0x76   :  { %519 = vmatpush.msra.mxu3 %v1439_v54  ;;  %458 = vmatpush.msra.mxu0 %v1443_v56  ;;  %v1480_v54 = vld [vmem:[#allocation8 + $0x2e8] sm:$0xff] }
  0x77   :  { %478 = vmatpush.msra.mxu1 %v1441_v55  ;;  %500 = vmatpush.msra.mxu2 %v1449_v57  ;;  %v1524_v57 = vld [vmem:[#allocation8 + $0x268] sm:$0xff] }
  0x78   :  { %520 = vmatpush.msra.mxu3 %v1451_v58  ;;  %459 = vmatpush.msra.mxu0 %v1455_v60  ;;  %v1483_v58 = vld [vmem:[#allocation8 + $0x1e8] sm:$0xff]  ;;  %1751 = vst [vmem:[#allocation38_spill] sm:$0xff] %v1524_v57 }
  0x79   :  { %479 = vmatpush.msra.mxu1 %v1453_v59  ;;  %1743 = vst [vmem:[#allocation30_spill] sm:$0xff] %v1483_v58 }
  0x7a   :  { %460 = vmatpush.msra.mxu0 %v1463_v62  ;;  %521 = vmatpush.msra.mxu3 %v1533_v18  ;;  %v1551_v18 = vld [vmem:[#allocation8 + $0x168] sm:$0xff] }
  0x7b   :  { %480 = vmatpush.msra.mxu1 %v1461_v61 }
  0x7c   :  { %461 = vmatpush.msra.mxu0 %v1471_v0  ;;  %593 = vmatpush.msrb.mxu3 %v1298_v7  ;;  %v1565_v7 = vld [vmem:[#allocation8 + $0x148] sm:$0xff] }
  0x7d   :  { %481 = vmatpush.msra.mxu1 %v1469_v63 }
  0x7e   :  { %526 = vmatpush.msrb.mxu0 %v1477_v2  ;;  %v1505_v2 = vld [vmem:[#allocation8 + $0x2a8] sm:$0xff]  ;;  %594 = vmatpush.msrb.mxu3 %v1311_v11  ;;  %v1573_v11 = vld [vmem:[#allocation8 + $0x138] sm:$0xff] }
  0x7f   :  { %546 = vmatpush.msrb.mxu1 %v1474_v1 }
  0x80   :  { %527 = vmatpush.msrb.mxu0 %v1483_v58  ;;  %v1511_v58 = vld [vmem:[#allocation8 + $0x298] sm:$0xff]  ;;  %595 = vmatpush.msrb.mxu3 %v1321_v15 }
  0x81   :  { %547 = vmatpush.msrb.mxu1 %v1480_v54  ;;  %v1584_v15 = vld [vmem:[#allocation8 + $0x118] sm:$0xff] }
  0x82   :  { %528 = vmatpush.msrb.mxu0 %v1489_v46  ;;  %v1517_v46 = vld [vmem:[#allocation8 + $0x288] sm:$0xff]  ;;  %596 = vmatpush.msrb.mxu3 %v1333_v19  ;;  %v976_v19 = vmov 0.0  }
  0x83   :  { %548 = vmatpush.msrb.mxu1 %v1487_v50  ;;  %1749 = vst [vmem:[#allocation36_spill] sm:$0xff] %v1517_v46  ;;  %522 = vmatmul.f32.vlgmr.msra.gmra.mxu3 %v976_v19 }
  0x84   :  { %529 = vmatpush.msrb.mxu0 %v1495_v38  ;;  %v1521_v38 = vld [vmem:[#allocation8 + $0x278] sm:$0xff]  ;;  %597 = vmatpush.msrb.mxu3 %v1345_v23 }
  0x85   :  { %549 = vmatpush.msrb.mxu1 %v1493_v42  ;;  %1750 = vst [vmem:[#allocation37_spill] sm:$0xff] %v1521_v38  ;;  %462 = vmatmul.f32.vlgmr.msra.gmra.mxu0 %v976_v19 }
  0x86   :  { %530 = vmatpush.msrb.mxu0 %v1501_v30  ;;  %v1527_v30 = vld [vmem:[#allocation8 + $0x258] sm:$0xff]  ;;  %598 = vmatpush.msrb.mxu3 %v1357_v27 }
  0x87   :  { %550 = vmatpush.msrb.mxu1 %v1499_v34  ;;  %1752 = vst [vmem:[#allocation39_spill] sm:$0xff] %v1527_v30 }
  0x88   :  { %531 = vmatpush.msrb.mxu0 %v1507_v26  ;;  %v1531_v26 = vld [vmem:[#allocation8 + $0x200] sm:$0xff]  ;;  %599 = vmatpush.msrb.mxu3 %v1369_v31 }
  0x89   :  { %551 = vmatpush.msrb.mxu1 %v1505_v2  ;;  %501 = vmatpush.msra.mxu2 %v1531_v26  ;;  %v1763_v31 = vld [vmem:[#allocation20_spill] sm:$0xff] }
  0x8a   :  { %532 = vmatpush.msrb.mxu0 %v1513_v22  ;;  %v1537_v22 = vld [vmem:[#allocation8 + $0x188] sm:$0xff]  ;;  %600 = vmatpush.msrb.mxu3 %v1381_v35 }
  0x8b   :  { %552 = vmatpush.msrb.mxu1 %v1511_v58  ;;  %1754 = vst [vmem:[#allocation41_spill] sm:$0xff] %v1537_v22  ;;  %573 = vmatpush.msrb.mxu2 %v1300_v8  ;;  %v1561_v8 = vld [vmem:[#allocation8 + $0x218] sm:$0xff] }
  0x8c   :  { %533 = vmatpush.msrb.mxu0 %v1537_v22  ;;  %v1559_v22 = vld [vmem:[#allocation8 + $0x158] sm:$0xff]  ;;  %601 = vmatpush.msrb.mxu3 %v1393_v39  ;;  %v1765_v39 = vld [vmem:[#allocation21_spill] sm:$0xff] }
  0x8d   :  { %553 = vmatpush.msrb.mxu1 %v1517_v46  ;;  %v1539_v46 = vld [vmem:[#allocation8 + $0x248] sm:$0xff]  ;;  %574 = vmatpush.msrb.mxu2 %v1313_v12 }
  0x8e   :  { %v1579_v12 = vld [vmem:[#allocation8 + $0x128] sm:$0xff]  ;;  %602 = vmatpush.msrb.mxu3 %v1405_v43 }
  0x8f   :  { %554 = vmatpush.msrb.mxu1 %v1521_v38  ;;  %v1543_v38 = vld [vmem:[#allocation8 + $0x178] sm:$0xff]  ;;  %575 = vmatpush.msrb.mxu2 %v1323_v16  ;;  %v1590_v16 = vld [vmem:[#allocation8 + $0x108] sm:$0xff] }
  0x90   :  { %1755 = vst [vmem:[#allocation42_spill] sm:$0xff] %v1543_v38  ;;  %534 = vmatpush.msrb.mxu0 %v1543_v38  ;;  %v1567_v38 = vld [vmem:[#allocation8 + $0x208] sm:$0xff]  ;;  %603 = vmatpush.msrb.mxu3 %v1417_v47 }
  0x91   :  { %555 = vmatpush.msrb.mxu1 %v1524_v57  ;;  %v1545_v57 = vld [vmem:[#allocation8 + $0x238] sm:$0xff]  ;;  %576 = vmatpush.msrb.mxu2 %v1335_v20  ;;  %v1769_v47 = vld [vmem:[#allocation25_spill] sm:$0xff] }
  0x92   :  { %535 = vmatpush.msrb.mxu0 %v1551_v18  ;;  %604 = vmatpush.msrb.mxu3 %v1429_v51  ;;  %v1775_v51 = vld [vmem:[#allocation40_spill] sm:$0xff] }
  0x93   :  { %556 = vmatpush.msrb.mxu1 %v1527_v30  ;;  %v1553_v30 = vld [vmem:[#allocation8 + $0x228] sm:$0xff]  ;;  %577 = vmatpush.msrb.mxu2 %v1347_v24 }
  0x94   :  { %536 = vmatpush.msrb.mxu0 %v1559_v22  ;;  %605 = vmatpush.msrb.mxu3 %v1441_v55  ;;  %v812_v24 = vld [vmem:[%s1702_s5] ss:$0 sm:$0xff]  ;;  %v1779_v55 = vld [vmem:[#allocation35_spill] sm:$0xff] }
  0x95   :  { %557 = vmatpush.msrb.mxu1 %v1539_v46  ;;  %578 = vmatpush.msrb.mxu2 %v1359_v28  ;;  %v1759_v28 = vld [vmem:[#allocation18_spill] sm:$0xff] }
  0x96   :  { %537 = vmatpush.msrb.mxu0 %v1565_v7  ;;  %606 = vmatpush.msrb.mxu3 %v1453_v59  ;;  %v710_v59 = vld [vmem:[#allocation9 + $0x38] sm:$0xff] }
  0x97   :  { %558 = vmatpush.msrb.mxu1 %v1545_v57  ;;  %579 = vmatpush.msrb.mxu2 %v1371_v32 }
  0x98   :  { %538 = vmatpush.msrb.mxu0 %v1573_v11  ;;  %607 = vmatpush.msrb.mxu3 %v1461_v61 }
  0x99   :  { %559 = vmatpush.msrb.mxu1 %v1553_v30  ;;  %580 = vmatpush.msrb.mxu2 %v1383_v36 }
  0x9a   :  { %539 = vmatpush.msrb.mxu0 %v1579_v12  ;;  %608 = vmatpush.msrb.mxu3 %v1469_v63  ;;  %v706_v63 = vld [vmem:[#allocation9 + $0x18] sm:$0xff] }
  0x9b   :  { %560 = vmatpush.msrb.mxu1 %v1561_v8  ;;  %581 = vmatpush.msrb.mxu2 %v1395_v40  ;;  %v1766_v40 = vld [vmem:[#allocation22_spill] sm:$0xff] }
  0x9c   :  { %540 = vmatpush.msrb.mxu0 %v1584_v15  ;;  %673 = vmatpush.msra.mxu3 %v1474_v1  ;;  %v705_v1 = vld [vmem:[#allocation9 + $0x10] sm:$0xff] }
  0x9d   :  { %561 = vmatpush.msrb.mxu1 %v1567_v38  ;;  %582 = vmatpush.msrb.mxu2 %v1407_v44  ;;  %v1768_v44 = vld [vmem:[#allocation24_spill] sm:$0xff] }
  0x9e   :  { %541 = vmatpush.msrb.mxu0 %v1590_v16  ;;  %674 = vmatpush.msra.mxu3 %v1480_v54  ;;  %v1778_v54 = vld [vmem:[#allocation34_spill] sm:$0xff] }
  0x9f   :  { %583 = vmatpush.msrb.mxu2 %v1419_v48  ;;  %v1771_v48 = vld [vmem:[#allocation26_spill] sm:$0xff] }
  0xa0   :  { %613 = vmatpush.msra.mxu0 %v1283_v3  ;;  %675 = vmatpush.msra.mxu3 %v1487_v50  ;;  %v1773_v50 = vld [vmem:[#allocation28_spill] sm:$0xff] }
  0xa1   :  { %584 = vmatpush.msrb.mxu2 %v1431_v52  ;;  %v1776_v52 = vld [vmem:[#allocation32_spill] sm:$0xff] }
  0xa2   :  { %614 = vmatpush.msra.mxu0 %v1290_v5  ;;  %676 = vmatpush.msra.mxu3 %v1493_v42  ;;  %v1767_v42 = vld [vmem:[#allocation23_spill] sm:$0xff] }
  0xa3   :  { %585 = vmatpush.msrb.mxu2 %v1443_v56  ;;  %v1781_v56 = vld [vmem:[#allocation42_spill] sm:$0xff] }
  0xa4   :  { %615 = vmatpush.msra.mxu0 %v1306_v9  ;;  %677 = vmatpush.msra.mxu3 %v1499_v34  ;;  %v1764_v34 = vld [vmem:[#allocation39_spill] sm:$0xff] }
  0xa5   :  { %586 = vmatpush.msrb.mxu2 %v1455_v60  ;;  %v709_v60 = vld [vmem:[#allocation9 + $0x30] sm:$0xff] }
  0xa6   :  { %616 = vmatpush.msra.mxu0 %v1317_v13  ;;  %678 = vmatpush.msra.mxu3 %v1505_v2 }
  0xa7   :  { %587 = vmatpush.msrb.mxu2 %v1463_v62 }
  0xa8   :  { %617 = vmatpush.msra.mxu0 %v1329_v17  ;;  %679 = vmatpush.msra.mxu3 %v1511_v58 }
  0xa9   :  { %588 = vmatpush.msrb.mxu2 %v1471_v0 }
  0xaa   :  { %618 = vmatpush.msra.mxu0 %v1341_v21 }
  0xac   :  { %619 = vmatpush.msra.mxu0 %v1353_v25  ;;  %v1757_v25 = vld [vmem:[#allocation27_spill] sm:$0xff] }
  0xae   :  { %620 = vmatpush.msra.mxu0 %v1365_v29  ;;  %v1761_v29 = vld [vmem:[#allocation19_spill] sm:$0xff] }
  0xb0   :  { %621 = vmatpush.msra.mxu0 %v1377_v33 }
  0xb2   :  { %622 = vmatpush.msra.mxu0 %v1389_v37 }
  0xb4   :  { %623 = vmatpush.msra.mxu0 %v1401_v41 }
  0xb6   :  { %624 = vmatpush.msra.mxu0 %v1413_v45 }
  0xb8   :  { %625 = vmatpush.msra.mxu0 %v1425_v49  ;;  %v1772_v49 = vld [vmem:[#allocation30_spill] sm:$0xff] }
  0xba   :  { %626 = vmatpush.msra.mxu0 %v1437_v53  ;;  %v1777_v53 = vld [vmem:[#allocation33_spill] sm:$0xff] }
  0xbc   :  { %627 = vmatpush.msra.mxu0 %v1757_v25 }
  0xbe   :  { %v330_v3 = vpop.f32.mrf.mxu2  ;;  %628 = vmatpush.msra.mxu0 %v1531_v26 }
  0xbf   :  { %v350_v5 = vpop.f32.mrf.mxu3 }
  0xc0   :  { %v290_v9 = vpop.f32.mrf.mxu0  ;;  %v351_v23 = vadd.f32 %v350_v5, %v330_v3 }
  0xc1   :  { %v310_v20 = vpop.f32.mrf.mxu1 }
  0xc2   :  { %v311_v13 = vadd.f32 %v310_v20, %v290_v9 }
  0xc4   :  { %v353_v17 = vmax.f32 %v311_v13, %v351_v23 }
  0xc6   :  { %v354_v21 = vadd.f32 %v812_v24, %v353_v17 }
  0xc8   :  { %v355_v27 = vmax.f32 %v354_v21, 0.0 }
  0xca   :  { %482 = vmatmul.f32.vlgmr.msra.gmra.mxu1 %v355_v27  ;;  %542 = vmatmul.f32.vlgmr.msrb.gmra.mxu0 %v355_v27 }
  0xcb   :  { %633 = vmatpush.msra.mxu1 %v1285_v4  ;;  %v1756_v4 = vld [vmem:[#allocation17_spill] sm:$0xff]  ;;  %726 = vmatpush.msrb.mxu0 %v710_v59 }
  0xcd   :  { %634 = vmatpush.msra.mxu1 %v1292_v6  ;;  %v1758_v6 = vld [vmem:[#allocation36_spill] sm:$0xff]  ;;  %727 = vmatpush.msrb.mxu0 %v709_v60 }
  0xce   :  { %680 = vmatpush.msra.mxu3 %v1758_v6 }
  0xcf   :  { %635 = vmatpush.msra.mxu1 %v1308_v10  ;;  %v1760_v10 = vld [vmem:[#allocation37_spill] sm:$0xff] }
  0xd0   :  { %681 = vmatpush.msra.mxu3 %v1760_v10 }
  0xd1   :  { %636 = vmatpush.msra.mxu1 %v1319_v14  ;;  %v1762_v14 = vld [vmem:[#allocation38_spill] sm:$0xff] }
  0xd2   :  { %629 = vmatmul.f32.vlgmr.msra.gmra.mxu0 %v976_v19  ;;  %682 = vmatpush.msra.mxu3 %v1762_v14  ;;  %v703_v14 = vld [vmem:[#allocation9] sm:$0xff] }
  0xd3   :  { %637 = vmatpush.msra.mxu1 %v1756_v4 }
  0xd4   :  { %683 = vmatpush.msra.mxu3 %v1764_v34  ;;  %v744_v34 = vld [vmem:[#allocation11 + $0x28] sm:$0xff] }
  0xd5   :  { %638 = vmatpush.msra.mxu1 %v1759_v28 }
  0xd6   :  { %684 = vmatpush.msra.mxu3 %v1539_v46  ;;  %v1770_v46 = vld [vmem:[#allocation29_spill] sm:$0xff] }
  0xd7   :  { %639 = vmatpush.msra.mxu1 %v1761_v29  ;;  %v704_v29 = vld [vmem:[#allocation9 + $0x8] sm:$0xff] }
  0xd8   :  { %685 = vmatpush.msra.mxu3 %v1545_v57 }
  0xd9   :  { %640 = vmatpush.msra.mxu1 %v1763_v31  ;;  %v746_v31 = vld [vmem:[#allocation11 + $0x38] sm:$0xff] }
  0xda   :  { %v376_v32 = vpop.f32.mrf.mxu0  ;;  %v416_v36 = vpop.f32.mrf.mxu2  ;;  %686 = vmatpush.msra.mxu3 %v1553_v30  ;;  %v1774_v30 = vld [vmem:[#allocation31_spill] sm:$0xff] }
  0xdb   :  { %v396_v33 = vpop.f32.mrf.mxu1  ;;  %v436_v37 = vpop.f32.mrf.mxu3  ;;  %641 = vmatpush.msra.mxu1 %v1765_v39 }
  0xdc   :  { %v397_v35 = vadd.f32 %v396_v33, %v376_v32  ;;  %v437_v26 = vadd.f32 %v436_v37, %v416_v36  ;;  %687 = vmatpush.msra.mxu3 %v1561_v8  ;;  %v745_v32 = vld [vmem:[#allocation11 + $0x30] sm:$0xff]  ;;  %v814_v33 = vld [vmem:[%s1702_s5 + $0x2] ss:$0 sm:$0xff]  ;;  %v742_v36 = vld [vmem:[#allocation11 + $0x18] sm:$0xff] }
  0xdd   :  { %642 = vmatpush.msra.mxu1 %v1766_v40  ;;  %v741_v40 = vld [vmem:[#allocation11 + $0x10] sm:$0xff] }
  0xde   :  { %v439_v41 = vmax.f32 %v397_v35, %v437_v26  ;;  %688 = vmatpush.msra.mxu3 %v1567_v38  ;;  %v1780_v38 = vld [vmem:[#allocation41_spill] sm:$0xff]  ;;  %v743_v35 = vld [vmem:[#allocation11 + $0x20] sm:$0xff] }
  0xdf   :  { %643 = vmatpush.msra.mxu1 %v1767_v42  ;;  %v739_v42 = vld [vmem:[#allocation11] sm:$0xff] }
  0xe0   :  { %v440_v43 = vadd.f32 %v812_v24, %v439_v41  ;;  %v813_v24 = vld [vmem:[%s1702_s5 + $0x1] ss:$0 sm:$0xff]  ;;  %s978_s5 = smov [#allocation12]  }
  0xe1   :  { %644 = vmatpush.msra.mxu1 %v1768_v44  ;;  %v740_v41 = vld [vmem:[#allocation11 + $0x8] sm:$0xff]  ;;  %s784_s28 = sshll.u32 %s978_s5, 4  ;;  %s785_s28 = int_to_ptr.vmem [resolvable:$true] %s784_s28 }
  0xe2   :  { %v441_v45 = vmax.f32 %v440_v43, 0.0 }
  0xe3   :  { %645 = vmatpush.msra.mxu1 %v1769_v47 }
  0xe4   :  { %502 = vmatmul.f32.vlgmr.msra.gmra.mxu2 %v441_v45  ;;  %562 = vmatmul.f32.vlgmr.msrb.gmra.mxu1 %v441_v45 }
  0xe5   :  { %609 = vmatmul.f32.vlgmr.msrb.gmra.mxu3 %v441_v45  ;;  %653 = vmatpush.msra.mxu2 %v1770_v46 }
  0xe6   :  { %646 = vmatpush.msra.mxu1 %v1771_v48 }
  0xe7   :  { %654 = vmatpush.msra.mxu2 %v1772_v49 }
  0xe8   :  { %647 = vmatpush.msra.mxu1 %v1773_v50 }
  0xe9   :  { %655 = vmatpush.msra.mxu2 %v1774_v30 }
  0xea   :  { %648 = vmatpush.msra.mxu1 %v1775_v51 }
  0xeb   :  { %656 = vmatpush.msra.mxu2 %v1776_v52 }
  0xec   :  { %589 = vmatmul.f32.vlgmr.msrb.gmra.mxu2 %v355_v27  ;;  %649 = vmatmul.f32.vlgmr.msra.gmra.mxu1 %v355_v27 }
  0xed   :  { %657 = vmatpush.msra.mxu2 %v1777_v53  ;;  %689 = vmatmul.f32.vlgmr.msra.gmra.mxu3 %v976_v19 }
  0xee   :  { %761 = vmatpush.msrb.mxu1 %v746_v31 }
  0xef   :  { %658 = vmatpush.msra.mxu2 %v1778_v54 }
  0xf0   :  { %762 = vmatpush.msrb.mxu1 %v745_v32 }
  0xf1   :  { %659 = vmatpush.msra.mxu2 %v1779_v55 }
  0xf2   :  { %763 = vmatpush.msrb.mxu1 %v744_v34 }
  0xf3   :  { %660 = vmatpush.msra.mxu2 %v1780_v38 }
  0xf4   :  { %764 = vmatpush.msrb.mxu1 %v743_v35 }
  0xf5   :  { %661 = vmatpush.msra.mxu2 %v1781_v56 }
  0xf6   :  { %765 = vmatpush.msrb.mxu1 %v742_v36 }
  0xf7   :  { %662 = vmatpush.msra.mxu2 %v1551_v18  ;;  %v708_v18 = vld [vmem:[#allocation9 + $0x28] sm:$0xff] }
  0xf8   :  { %728 = vmatpush.msrb.mxu0 %v708_v18  ;;  %766 = vmatpush.msrb.mxu1 %v741_v40 }
  0xf9   :  { %663 = vmatpush.msra.mxu2 %v1559_v22  ;;  %v707_v22 = vld [vmem:[#allocation9 + $0x20] sm:$0xff] }
  0xfa   :  { %729 = vmatpush.msrb.mxu0 %v707_v22  ;;  %767 = vmatpush.msrb.mxu1 %v740_v41 }
  0xfb   :  { %664 = vmatpush.msra.mxu2 %v1565_v7 }
  0xfc   :  { %730 = vmatpush.msrb.mxu0 %v706_v63  ;;  %768 = vmatpush.msrb.mxu1 %v739_v42 }
  0xfd   :  { %665 = vmatpush.msra.mxu2 %v1573_v11 }
  0xfe   :  { %731 = vmatpush.msrb.mxu0 %v705_v1 }
  0xff   :  { %666 = vmatpush.msra.mxu2 %v1579_v12 }
 0x100   :  { %732 = vmatpush.msrb.mxu0 %v704_v29 }
 0x101   :  { %667 = vmatpush.msra.mxu2 %v1584_v15 }
 0x102   :  { %v463_v58 = vpop.f32.mrf.mxu0  ;;  %733 = vmatpush.msrb.mxu0 %v703_v14 }
 0x103   :  { %668 = vmatpush.msra.mxu2 %v1590_v16 }
 0x104   :  { %669 = vmatmul.f32.vlgmr.msra.gmra.mxu2 %v441_v45 }
 0x106   :  { %v523_v62 = vpop.f32.mrf.mxu3 }
 0x147   :  { %v483_v57 = vpop.f32.mrf.mxu1  ;;  %v543_v2 = vpop.f32.mrf.mxu0 }
 0x148   :  { %v484_v11 = vadd.f32 %v483_v57, %v463_v58  ;;  %v544_v12 = vadd.f32 %v543_v2, %v523_v62 }
 0x14f   :  { %v630_v5 = vpop.f32.mrf.mxu0 }
 0x161   :  { %v563_v0 = vpop.f32.mrf.mxu1 }
 0x162   :  { %v564_v16 = vadd.f32 %v563_v0, %v544_v12 }
 0x167   :  { %v503_v61 = vpop.f32.mrf.mxu2 }
 0x168   :  { %v610_v8 = vpop.f32.mrf.mxu3  ;;  %v504_v15 = vadd.f32 %v503_v61, %v484_v11 }
 0x169   :  { %v650_v19 = vpop.f32.mrf.mxu1 }
 0x16a   :  { %v566_v23 = vmax.f32 %v504_v15, %v564_v16 }
 0x16c   :  { %v567_v4 = vadd.f32 %v813_v24, %v566_v23 }
 0x16e   :  { %v568_v6 = vmax.f32 %v567_v4, 0.0 }
 0x16f   :  { %v590_v7 = vpop.f32.mrf.mxu2 }
 0x170   :  { %v611_v3 = vadd.f32 %v610_v8, %v590_v7  ;;  %v690_v20 = vpop.f32.mrf.mxu3 }
 0x172   :  { %v631_v17 = vadd.f32 %v630_v5, %v611_v3 }
 0x187   :  { %v670_v9 = vpop.f32.mrf.mxu2 }
 0x188   :  { %v671_v13 = vadd.f32 %v670_v9, %v650_v19 }
 0x18a   :  { %v691_v21 = vadd.f32 %v690_v20, %v671_v13 }
 0x18c   :  { %v693_v27 = vmax.f32 %v631_v17, %v691_v21 }
 0x18e   :  { %v694_v25 = vadd.f32 %v813_v24, %v693_v27 }
 0x190   :  { %v695_v28 = vmax.f32 %v694_v25, 0.0 }
 0x192   :  { %v696_v10 = vadd.f32 %v695_v28, %v568_v6 }
 0x194   :  { %698 = vrot.lane.b32.xlu0 %v696_v10, %s977_s25 }
 0x19c   :  { %747 = vrot.lane.b32.xlu0 %v814_v33, %s977_s25 }
 0x206   :  { %v699_v37 = vpop.permute.xlu0 %698 }
 0x207   :  { %v701_v39 = vadd.f32 %v699_v37, %v696_v10 }
 0x209   :  { %v702_v26 = vmul.f32 0.25, %v701_v39 }
 0x20b   :  { %798 = vmatmul.msk.f32.vlgmr.msrb.gmra.mxu0 %vm714_vm0, %v702_v26 }
 0x20e   :  { %v748_v47 = vpop.permute.xlu0 %747 }
 0x288   :  { %v735_v43 = vpop.f32.mrf.mxu0 }
 0x289   :  { %v736_v44 = vadd.f32 %v814_v33, %v735_v43 }
 0x28b   :  { %v738_v45 = vmax.f32 %v736_v44, 0.0 }
 0x28d   :  { %799 = vmatmul.msk.f32.vlgmr.msrb.gmra.mxu1 %vm714_vm0, %v738_v45 }
 0x30a   :  { %v770_v46 = vpop.f32.mrf.mxu1 }
 0x30b   :  { %v771_v48 = vadd.f32 %v770_v46, %v748_v47 }
 0x30d   :  { %774 = vrot.lane.b32.xlu1 %v771_v48, %s977_s25 }
 0x37f   :  { %v775_v49 = vpop.permute.xlu1 %774 }
 0x380   :  { %v777_v50 = vsel %vm714_vm0, %v702_v26, %v775_v49 }
 0x381   :  { %778 = vst [vmem:[#allocation12] sm:$0xff] %v777_v50 }
 0x382   :  { %789 = dma.vmem_to_hbm [thread:$0]  %s785_s28, 128, %s787_s7, [#allocation5]  }
 0x383   :  { %965 = dma.done.wait [#allocation5], 128  }
 0x384   :  { %966 = vsyncadd [#allocation5], 4294967168 }
 0x385   :  { %794 = vsyncpa [#allocation4], 1 }
 0x386   :  { %795 = vsyncpa [#allocation7], 1 }
 0x387   :  { %796 = vsyncpa [#allocation10], 1 }
 0x388   :  { %797 = vsyncpa [#allocation5], 1 }

</bundles_post_ra>
